<compile_context>
chip_gen: v6e
topology: v6e:2x2x1
jax: 0.10.0
libtpu: 0.0.40
codegen_flags: <defaults>
</compile_context>

<pallas_src>
import math

import jax
import jax.numpy as jnp
from jax.experimental import pallas as pl
from jax.experimental.pallas import tpu as pltpu


def _copy_kernel(x_ref, o_ref):
    # Pure tile copy: the shape change is done (for free) in the wrapper.
    o_ref[...] = x_ref[...]


def _resolve_shape(in_shape, target_shape):
    """torch.view-style shape resolution (supports a single -1)."""
    total = math.prod(in_shape)
    target = list(target_shape)
    if target.count(-1) > 1:
        raise ValueError("only one -1 dimension allowed")
    if -1 in target:
        known = math.prod(d for d in target if d != -1)
        target[target.index(-1)] = total // known
    if math.prod(target) != total:
        raise ValueError(f"cannot view {in_shape} as {tuple(target_shape)}")
    return tuple(target)


def _copy_2d_tiled(slab):
    """Tiled, pipelined copy of a lane-dense (rows, L) slab (L % 128 == 0)."""
    rows, lanes = slab.shape
    itemsize = jnp.dtype(slab.dtype).itemsize

    # ~2 MiB per block: big enough to hide the ~0.35 us/step pipeline overhead
    # and reach ~85%+ of HBM roofline, small enough that in+out double buffers
    # (4 x block) stay well under the 16/32/32 MiB scoped-VMEM defaults on
    # v5e/v6e/v7x.
    target_block_bytes = 2 * 1024 * 1024
    tile_r = max(1, target_block_bytes // (lanes * itemsize))
    if tile_r >= rows:
        tile_r = rows                       # block == full array: always legal
    else:
        tile_r = max(8, (tile_r // 8) * 8)  # keep sublane dim a multiple of 8
        if tile_r > rows:
            tile_r = rows

    grid = (pl.cdiv(rows, tile_r),)
    return pl.pallas_call(
        _copy_kernel,
        out_shape=jax.ShapeDtypeStruct((rows, lanes), slab.dtype),
        grid=grid,
        in_specs=[pl.BlockSpec((tile_r, lanes), lambda i: (i, 0))],
        out_specs=pl.BlockSpec((tile_r, lanes), lambda i: (i, 0)),
        compiler_params=pltpu.CompilerParams(
            dimension_semantics=("parallel",)),  # megacore / 2-TC sharding
    )(slab)


def _copy_1d_full(flat):
    """Fallback: single full-array block (only for element counts not
    divisible by 128, which are small in practice)."""
    # TODO(synk): very large inputs whose element count is not a multiple of
    # 128 would need padding to a lane-dense slab to avoid a full-array VMEM
    # block; not needed for the shapes this module is used with.
    n = flat.shape[0]
    return pl.pallas_call(
        _copy_kernel,
        out_shape=jax.ShapeDtypeStruct((n,), flat.dtype),
        in_specs=[pl.BlockSpec((n,), lambda: (0,))],
        out_specs=pl.BlockSpec((n,), lambda: (0,)),
    )(flat)


def reshape_pallas(x, *shape):
    """Pallas equivalent of Reshape(*shape)(x)  ==  x.view(shape)."""
    out_shape = _resolve_shape(x.shape, shape)
    total = math.prod(x.shape)

    if total == 0:
        # Zero-size tensors: nothing to copy, reshape is pure metadata.
        return jnp.reshape(x, out_shape)

    # Flatten in the wrapper (metadata-only for a contiguous array).
    flat = jnp.reshape(x, (total,))

    # Pack sub-32-bit dtypes into uint32 words so the copy stays fully
    # lane-dense and DMA-bound (halves/quarters vld/vst count).
    itemsize = jnp.dtype(x.dtype).itemsize
    packed = False
    copy_src = flat
    if itemsize < 4 and (total * itemsize) % 4 == 0:
        per_word = 4 // itemsize
        copy_src = jax.lax.bitcast_convert_type(
            flat.reshape(total // per_word, per_word), jnp.uint32)
        packed = True

    n = copy_src.shape[0]

    # Pick the widest lane count (multiple of 128) that tiles the flat buffer.
    lanes = None
    for cand in (512, 256, 128):
        if n % cand == 0:
            lanes = cand
            break

    if lanes is None:
        out_flat = _copy_1d_full(copy_src)
    else:
        rows = n // lanes
        out_flat = _copy_2d_tiled(copy_src.reshape(rows, lanes)).reshape(n)

    if packed:
        out_flat = jax.lax.bitcast_convert_type(out_flat, x.dtype).reshape(total)

    # Final shape change is again pure metadata (done outside the kernel).
    return jnp.reshape(out_flat, out_shape)


class Reshape:
    """Mirror of the PyTorch module, backed by the Pallas copy kernel."""

    # TODO(synk): torch .view() errors on non-contiguous tensors; JAX arrays
    # have no contiguity concept, so that check has no equivalent here.

    def __init__(self, *args):
        self.shape = args

    def __call__(self, x):
        return reshape_pallas(x, *self.shape)


if __name__ == "__main__":
    key = jax.random.PRNGKey(0)
    # NCHW input, small shapes: batch=2, channels=4, spatial=16x16.
    x = jax.random.normal(key, (2, 4, 16, 16), dtype=jnp.float32)

    # Flatten CHW dims: (2, 4, 16, 16) -> (2, 1024), typical Reshape(B, -1).
    y = jax.block_until_ready(Reshape(2, -1)(x))
    ref = jnp.reshape(x, (2, -1))
    assert y.shape == (2, 1024), y.shape
    assert y.dtype == x.dtype
    assert bool(jnp.array_equal(y, ref))

    # -1-free path with an "awkward" trailing dim (16) — handled for free in
    # the wrapper, the kernel only ever sees the lane-dense slab.
    y2 = jax.block_until_ready(Reshape(8, 16, 16)(x))
    assert y2.shape == (8, 16, 16)
    assert bool(jnp.array_equal(y2, jnp.reshape(x, (8, 16, 16))))

    # Sub-32-bit dtype path (bf16 packed into uint32 words for the copy).
    xb = x.astype(jnp.bfloat16)
    y3 = jax.block_until_ready(Reshape(2, -1)(xb))
    assert y3.shape == (2, 1024) and y3.dtype == jnp.bfloat16
    assert bool(jnp.array_equal(y3, jnp.reshape(xb, (2, -1))))

    print("KERNEL_OK")
</pallas_src>

<mosaic_0001>
module attributes {stable_mosaic.version = 11 : i64} {
  func.func @_copy_kernel(%arg0: i32, %arg1: memref<4x512xf32, #tpu.memory_space<vmem>>, %arg2: memref<4x512xf32, #tpu.memory_space<vmem>>) attributes {dimension_semantics = [#tpu.dimension_semantics<parallel>], iteration_bounds = array<i64: 1>, scalar_prefetch = 0 : i64, scratch_operands = 0 : i64, tpu.core_type = #tpu.core_type<tc>, window_params = [{transform_indices = @transform_0, window_bounds = array<i64: 4, 512>}, {transform_indices = @transform_1, window_bounds = array<i64: 4, 512>}]} {
    %c0 = arith.constant 0 : index
    %c0_0 = arith.constant 0 : index
    %0 = vector.load %arg1[%c0, %c0_0] : memref<4x512xf32, #tpu.memory_space<vmem>>, vector<4x512xf32>
    %c0_1 = arith.constant 0 : index
    %c0_2 = arith.constant 0 : index
    %1 = vector.load %arg2[%c0_1, %c0_2] : memref<4x512xf32, #tpu.memory_space<vmem>>, vector<4x512xf32>
    tpu.vector_store %arg2[%c0_1, %c0_2], %0 {strides = array<i32>} : memref<4x512xf32, #tpu.memory_space<vmem>>, vector<4x512xf32>,
    return
  }
  func.func @transform_0(%arg0: i32) -> (i32, i32) {
    %c0_i32 = arith.constant 0 : i32
    %c0_i32_0 = arith.constant 0 : i32
    return %arg0, %c0_i32 : i32, i32
  }
  func.func @transform_1(%arg0: i32) -> (i32, i32) {
    %c0_i32 = arith.constant 0 : i32
    %c0_i32_0 = arith.constant 0 : i32
    return %arg0, %c0_i32 : i32, i32
  }
}

</mosaic_0001>

<bundles_post_ra>
// kernel: tpu_custom_call.1
= control target key start
LH: loop header
LB: loop body
LE: loop exit
PB: predicated region body
PF: predicated region fallthrough
CT: control target
= control target key end

     0   :  { %6 = vsyncpa [#allocation3], 0  ;;  %s104_s0 = inlined_call_operand.hbm [shape: f32[4,512], index: 0, kind: input, shape index: {}]   ;;  %s105_s1 = inlined_call_operand.hbm [shape: f32[4,512], index: 1, kind: output, shape index: {}]  }
   0x1   :  { %7 = vsyncpa [#allocation4], 0  ;;  %s86_s6 = smov [#allocation2]  }
   0x2   :  { %s14_s7 = sshll.u32 %s86_s6, 4  ;;  %s15_s7 = int_to_ptr.vmem [resolvable:$true] %s14_s7 }
   0x3   :  { %s50_s8 = scalar_lea.vmem %s15_s7, 256  ;;  %p55_p1 = scmp.lt.s32.totalorder %s15_s7, %s15_s7 }
   0x4   :  { %p51_p0 = scmp.ne.s32.totalorder %s15_s7, %s50_s8  ;;  %p56_p2 = scmp.lt.s32.totalorder %s50_s8, %s50_s8 }
   0x6   :  { %p57_p3 = por %p56_p2, %p55_p1 }
   0x8   :  { %p58_p4 = pnand %p57_p3, %p51_p0 }
   0xa   :  { %61 = shalt.err (!%p58_p4)
}
   0xb   :  { %17 = dma.hbm_to_vmem [thread:$0]  %s104_s0, 256, %s15_s7, [#allocation3]  }
   0xc   :  { %82 = dma.done.wait [#allocation3], 256  }
   0xd   :  { %83 = vsyncadd [#allocation3], 4294967040  ;;  %s87_s11 = smov [#allocation5]   ;;  %v21_v0 = vld [vmem:[#allocation2] sm:$0xff]  ;;  %v22_v1 = vld [vmem:[#allocation2 + $0x8] sm:$0xff] }
   0xe   :  { %s31_s12 = sshll.u32 %s87_s11, 4  ;;  %23 = vst [vmem:[#allocation5] sm:$0xff] %v21_v0  ;;  %24 = vst [vmem:[#allocation5 + $0x8] sm:$0xff] %v22_v1  ;;  %s32_s12 = int_to_ptr.vmem [resolvable:$true] %s31_s12 }
   0xf   :  { %s62_s13 = scalar_lea.vmem %s32_s12, 256  ;;  %p67_p6 = scmp.lt.s32.totalorder %s32_s12, %s32_s12 }
  0x10   :  { %p63_p5 = scmp.ne.s32.totalorder %s32_s12, %s62_s13  ;;  %p68_p7 = scmp.lt.s32.totalorder %s62_s13, %s62_s13 }
  0x12   :  { %p69_p8 = por %p68_p7, %p67_p6 }
  0x14   :  { %p70_p9 = pnand %p69_p8, %p63_p5 }
  0x16   :  { %73 = shalt.err (!%p70_p9)
}
  0x17   :  { %34 = dma.vmem_to_hbm [thread:$0]  %s32_s12, 256, %s105_s1, [#allocation4]  }
  0x18   :  { %84 = dma.done.wait [#allocation4], 256  }
  0x19   :  { %85 = vsyncadd [#allocation4], 4294967040 }
  0x1a   :  { %38 = vsyncpa [#allocation3], 1 }
  0x1b   :  { %39 = vsyncpa [#allocation4], 1 }

</bundles_post_ra>
